<compile_context>
chip_gen: v6e
topology: v6e:2x2x1
jax: 0.10.0
libtpu: 0.0.40
codegen_flags: <defaults>
</compile_context>

<pallas_src>
import functools

import jax
import jax.numpy as jnp
from jax.experimental import pallas as pl
from jax.experimental.pallas import tpu as pltpu

NEG_SLOPE = 0.01  # nn.LeakyReLU() default negative_slope


def _leaky_relu(x):
    return jnp.where(x >= 0, x, NEG_SLOPE * x)


def _round_up(n, m):
    return (n + m - 1) // m * m


def generator_kernel(x_ref, w1_ref, b1_ref, w2_ref, b2_ref, w3_ref, b3_ref, o_ref):
    # x_ref: (TB, xdim)   w1: (xdim, hdim)   w2: (hdim, hdim)   w3: (hdim, ydim)
    # Dot inputs may be bf16 (cast in the wrapper); accumulation and all
    # elementwise math stay in f32.
    x = x_ref[...]

    h = jnp.dot(x, w1_ref[...], preferred_element_type=jnp.float32) + b1_ref[...]
    h = _leaky_relu(h)

    h = jnp.dot(h.astype(w2_ref.dtype), w2_ref[...],
                preferred_element_type=jnp.float32) + b2_ref[...]
    h = _leaky_relu(h)

    h = jnp.dot(h.astype(w3_ref.dtype), w3_ref[...],
                preferred_element_type=jnp.float32) + b3_ref[...]
    o_ref[...] = jnp.tanh(h)


def generator_forward(x, params, *, batch_tile=512, use_bf16=False):
    """Pallas forward of the Generator.

    x: (B, xdim) float32.  Weights stored as (in, out), biases as (1, out).
    batch_tile: rows per grid step (clamped to a multiple of 8; 512-2048 is
                the sweet spot that amortizes per-step overhead).
    use_bf16:   cast x and weights to bf16 for the MXU (f32 accumulation and
                f32 elementwise). Recommended on v6e/v7x.
    """
    B, xdim = x.shape
    hdim = params["w1"].shape[1]
    ydim = params["w3"].shape[1]

    # Batch tile: multiple of 8 sublanes, no bigger than needed.
    tb = max(8, min(_round_up(batch_tile, 8), _round_up(B, 8)))
    b_pad = _round_up(B, tb)
    if b_pad != B:
        x = jnp.pad(x, ((0, b_pad - B), (0, 0)))
    grid = (b_pad // tb,)

    mxu_dtype = jnp.bfloat16 if use_bf16 else jnp.float32
    x_in = x.astype(mxu_dtype)
    w1 = params["w1"].astype(mxu_dtype)
    w2 = params["w2"].astype(mxu_dtype)
    w3 = params["w3"].astype(mxu_dtype)
    b1, b2, b3 = params["b1"], params["b2"], params["b3"]  # stay f32

    # x / out tiles walk the batch axis; weights & biases are resident
    # (constant block index -> DMA'd once, reused every grid step).
    x_spec = pl.BlockSpec((tb, xdim), lambda i: (i, 0))
    out_spec = pl.BlockSpec((tb, ydim), lambda i: (i, 0))

    def resident(shape):
        return pl.BlockSpec(shape, lambda i: (0, 0))

    itemsize = jnp.dtype(mxu_dtype).itemsize
    cost = pl.CostEstimate(
        flops=2 * b_pad * (xdim * hdim + hdim * hdim + hdim * ydim),
        transcendentals=b_pad * ydim,  # tanh
        bytes_accessed=(
            b_pad * xdim * itemsize                               # x
            + (xdim * hdim + hdim * hdim + hdim * ydim) * itemsize  # weights
            + (hdim + hdim + ydim) * 4                              # biases
            + b_pad * ydim * 4                                      # out
        ),
    )

    out = pl.pallas_call(
        generator_kernel,
        out_shape=jax.ShapeDtypeStruct((b_pad, ydim), jnp.float32),
        grid=grid,
        in_specs=[
            x_spec,
            resident((xdim, hdim)), resident((1, hdim)),
            resident((hdim, hdim)), resident((1, hdim)),
            resident((hdim, ydim)), resident((1, ydim)),
        ],
        out_specs=out_spec,
        compiler_params=pltpu.CompilerParams(
            dimension_semantics=("parallel",),
        ),
        cost_estimate=cost,
    )(x_in, w1, b1, w2, b2, w3, b3)

    return out[:B] if b_pad != B else out


def generator_apply(x, params, **kw):
    """Dispatcher: tiny batches are pure launch overhead for a custom kernel,
    so fall back to the fused-XLA reference below the pipelining threshold."""
    if x.shape[0] < 512:
        return generator_reference(x, params)
    return generator_forward(x, params, **kw)


def init_generator_params(key, ydim, xdim, hdim):
    """Deterministic init matching nn.Linear's U(-1/sqrt(fan_in), 1/sqrt(fan_in)).

    Weights are stored transposed relative to PyTorch: shape (in, out).
    """
    ks = jax.random.split(key, 6)

    def lin(kw, kb, fan_in, fan_out):
        bound = 1.0 / jnp.sqrt(fan_in)
        w = jax.random.uniform(kw, (fan_in, fan_out), jnp.float32, -bound, bound)
        b = jax.random.uniform(kb, (1, fan_out), jnp.float32, -bound, bound)
        return w, b

    w1, b1 = lin(ks[0], ks[1], xdim, hdim)
    w2, b2 = lin(ks[2], ks[3], hdim, hdim)
    w3, b3 = lin(ks[4], ks[5], hdim, ydim)
    return {"w1": w1, "b1": b1, "w2": w2, "b2": b2, "w3": w3, "b3": b3}


def generator_reference(x, p):
    """Pure-JAX reference (same math as the PyTorch module)."""
    h = _leaky_relu(x @ p["w1"] + p["b1"])
    h = _leaky_relu(h @ p["w2"] + p["b2"])
    return jnp.tanh(h @ p["w3"] + p["b3"])


if __name__ == "__main__":
    # Shapes consistent with the pinwheel GAN: small latent -> 2-D points.
    xdim, hdim, ydim = 4, 32, 2

    key = jax.random.PRNGKey(0)
    k_param, k_small, k_big = jax.random.split(key, 3)
    params = init_generator_params(k_param, ydim=ydim, xdim=xdim, hdim=hdim)

    # --- Toy batch (B=8): single 8-row tile; strict f32 check. ---
    x_small = jax.random.normal(k_small, (8, xdim), dtype=jnp.float32)
    out_small = jax.block_until_ready(generator_forward(x_small, params))
    ref_small = generator_reference(x_small, params)
    assert out_small.shape == (8, ydim), out_small.shape
    assert jnp.allclose(out_small, ref_small, atol=1e-5, rtol=1e-5), "small-batch mismatch"

    # --- Pipelined batch: multiple grid steps + partial-tile padding (B=1064,
    #     TB=512 -> padded to 1536, grid=(3,)). ---
    B = 1064
    x_big = jax.random.normal(k_big, (B, xdim), dtype=jnp.float32)
    ref_big = generator_reference(x_big, params)

    out_f32 = jax.block_until_ready(generator_forward(x_big, params, batch_tile=512))
    assert out_f32.shape == (B, ydim), out_f32.shape
    assert jnp.allclose(out_f32, ref_big, atol=1e-5, rtol=1e-5), "f32 big-batch mismatch"

    # bf16 MXU inputs (v6e/v7x fast path): f32 accumulation, relaxed tolerance.
    out_bf16 = jax.block_until_ready(
        generator_forward(x_big, params, batch_tile=512, use_bf16=True))
    assert out_bf16.shape == (B, ydim), out_bf16.shape
    assert jnp.max(jnp.abs(out_bf16 - ref_big)) < 2e-2, "bf16 big-batch mismatch"

    print("KERNEL_OK")
</pallas_src>

<mosaic_0001>
module attributes {stable_mosaic.version = 11 : i64} {
  func.func @generator_kernel(%arg0: i32, %arg1: memref<8x4xf32, #tpu.memory_space<vmem>>, %arg2: memref<4x32xf32, #tpu.memory_space<vmem>>, %arg3: memref<1x32xf32, #tpu.memory_space<vmem>>, %arg4: memref<32x32xf32, #tpu.memory_space<vmem>>, %arg5: memref<1x32xf32, #tpu.memory_space<vmem>>, %arg6: memref<32x2xf32, #tpu.memory_space<vmem>>, %arg7: memref<1x2xf32, #tpu.memory_space<vmem>>, %arg8: memref<8x2xf32, #tpu.memory_space<vmem>>) attributes {dimension_semantics = [#tpu.dimension_semantics<parallel>], iteration_bounds = array<i64: 1>, scalar_prefetch = 0 : i64, scratch_operands = 0 : i64, tpu.core_type = #tpu.core_type<tc>, window_params = [{transform_indices = @transform_0, window_bounds = array<i64: 8, 4>}, {pipeline_mode = #tpu.pipeline_mode<synchronous>, transform_indices = @transform_1, window_bounds = array<i64: 4, 32>}, {pipeline_mode = #tpu.pipeline_mode<synchronous>, transform_indices = @transform_2, window_bounds = array<i64: 1, 32>}, {pipeline_mode = #tpu.pipeline_mode<synchronous>, transform_indices = @transform_3, window_bounds = array<i64: 32, 32>}, {pipeline_mode = #tpu.pipeline_mode<synchronous>, transform_indices = @transform_4, window_bounds = array<i64: 1, 32>}, {pipeline_mode = #tpu.pipeline_mode<synchronous>, transform_indices = @transform_5, window_bounds = array<i64: 32, 2>}, {pipeline_mode = #tpu.pipeline_mode<synchronous>, transform_indices = @transform_6, window_bounds = array<i64: 1, 2>}, {transform_indices = @transform_7, window_bounds = array<i64: 8, 2>}]} {
    %c0 = arith.constant 0 : index
    %c0_0 = arith.constant 0 : index
    %0 = vector.load %arg1[%c0, %c0_0] : memref<8x4xf32, #tpu.memory_space<vmem>>, vector<8x4xf32>
    %c0_1 = arith.constant 0 : index
    %c0_2 = arith.constant 0 : index
    %1 = vector.load %arg2[%c0_1, %c0_2] : memref<4x32xf32, #tpu.memory_space<vmem>>, vector<4x32xf32>
    %cst = arith.constant dense<0.000000e+00> : vector<8x32xf32>
    %2 = tpu.matmul %0, %1, %cst {dimension_numbers = #tpu.dot_dimension_numbers<[1], [0], [0], [1], [0, 0, 1, 1], [], []>} : vector<8x4xf32>, vector<4x32xf32>, vector<8x32xf32> -> vector<8x32xf32>
    %c0_3 = arith.constant 0 : index
    %c0_4 = arith.constant 0 : index
    %3 = vector.load %arg3[%c0_3, %c0_4] : memref<1x32xf32, #tpu.memory_space<vmem>>, vector<1x32xf32>
    %4 = vector.broadcast %3 : vector<1x32xf32> to vector<8x32xf32>
    %5 = arith.addf %2, %4 : vector<8x32xf32>
    %cst_5 = arith.constant 0.000000e+00 : f32
    %6 = vector.broadcast %cst_5 : f32 to vector<8x32xf32>
    %7 = arith.cmpf oge, %5, %6 : vector<8x32xf32>
    %cst_6 = arith.constant 0.00999999977 : f32
    %8 = vector.broadcast %cst_6 : f32 to vector<8x32xf32>
    %9 = arith.mulf %8, %5 : vector<8x32xf32>
    %10 = arith.select %7, %5, %9 : vector<8x32xi1>, vector<8x32xf32>
    %c0_7 = arith.constant 0 : index
    %c0_8 = arith.constant 0 : index
    %11 = vector.load %arg4[%c0_7, %c0_8] : memref<32x32xf32, #tpu.memory_space<vmem>>, vector<32x32xf32>
    %cst_9 = arith.constant dense<0.000000e+00> : vector<8x32xf32>
    %12 = tpu.matmul %10, %11, %cst_9 {dimension_numbers = #tpu.dot_dimension_numbers<[1], [0], [0], [1], [0, 0, 1, 1], [], []>} : vector<8x32xf32>, vector<32x32xf32>, vector<8x32xf32> -> vector<8x32xf32>
    %c0_10 = arith.constant 0 : index
    %c0_11 = arith.constant 0 : index
    %13 = vector.load %arg5[%c0_10, %c0_11] : memref<1x32xf32, #tpu.memory_space<vmem>>, vector<1x32xf32>
    %14 = vector.broadcast %13 : vector<1x32xf32> to vector<8x32xf32>
    %15 = arith.addf %12, %14 : vector<8x32xf32>
    %cst_12 = arith.constant 0.000000e+00 : f32
    %16 = vector.broadcast %cst_12 : f32 to vector<8x32xf32>
    %17 = arith.cmpf oge, %15, %16 : vector<8x32xf32>
    %cst_13 = arith.constant 0.00999999977 : f32
    %18 = vector.broadcast %cst_13 : f32 to vector<8x32xf32>
    %19 = arith.mulf %18, %15 : vector<8x32xf32>
    %20 = arith.select %17, %15, %19 : vector<8x32xi1>, vector<8x32xf32>
    %c0_14 = arith.constant 0 : index
    %c0_15 = arith.constant 0 : index
    %21 = vector.load %arg6[%c0_14, %c0_15] : memref<32x2xf32, #tpu.memory_space<vmem>>, vector<32x2xf32>
    %cst_16 = arith.constant dense<0.000000e+00> : vector<8x2xf32>
    %22 = tpu.matmul %20, %21, %cst_16 {dimension_numbers = #tpu.dot_dimension_numbers<[1], [0], [0], [1], [0, 0, 1, 1], [], []>} : vector<8x32xf32>, vector<32x2xf32>, vector<8x2xf32> -> vector<8x2xf32>
    %c0_17 = arith.constant 0 : index
    %c0_18 = arith.constant 0 : index
    %23 = vector.load %arg7[%c0_17, %c0_18] : memref<1x2xf32, #tpu.memory_space<vmem>>, vector<1x2xf32>
    %24 = vector.broadcast %23 : vector<1x2xf32> to vector<8x2xf32>
    %25 = arith.addf %22, %24 : vector<8x2xf32>
    %26 = math.tanh %25 : vector<8x2xf32>
    %c0_19 = arith.constant 0 : index
    %c0_20 = arith.constant 0 : index
    %27 = vector.load %arg8[%c0_19, %c0_20] : memref<8x2xf32, #tpu.memory_space<vmem>>, vector<8x2xf32>
    tpu.vector_store %arg8[%c0_19, %c0_20], %26 {strides = array<i32>} : memref<8x2xf32, #tpu.memory_space<vmem>>, vector<8x2xf32>,
    return
  }
  func.func @transform_0(%arg0: i32) -> (i32, i32) {
    %c0_i32 = arith.constant 0 : i32
    %c0_i32_0 = arith.constant 0 : i32
    return %arg0, %c0_i32 : i32, i32
  }
  func.func @transform_1(%arg0: i32) -> (i32, i32) {
    %c0_i32 = arith.constant 0 : i32
    %c0_i32_0 = arith.constant 0 : i32
    %c0_i32_1 = arith.constant 0 : i32
    return %c0_i32, %c0_i32_0 : i32, i32
  }
  func.func @transform_2(%arg0: i32) -> (i32, i32) {
    %c0_i32 = arith.constant 0 : i32
    %c0_i32_0 = arith.constant 0 : i32
    %c0_i32_1 = arith.constant 0 : i32
    return %c0_i32, %c0_i32_0 : i32, i32
  }
  func.func @transform_3(%arg0: i32) -> (i32, i32) {
    %c0_i32 = arith.constant 0 : i32
    %c0_i32_0 = arith.constant 0 : i32
    %c0_i32_1 = arith.constant 0 : i32
    return %c0_i32, %c0_i32_0 : i32, i32
  }
  func.func @transform_4(%arg0: i32) -> (i32, i32) {
    %c0_i32 = arith.constant 0 : i32
    %c0_i32_0 = arith.constant 0 : i32
    %c0_i32_1 = arith.constant 0 : i32
    return %c0_i32, %c0_i32_0 : i32, i32
  }
  func.func @transform_5(%arg0: i32) -> (i32, i32) {
    %c0_i32 = arith.constant 0 : i32
    %c0_i32_0 = arith.constant 0 : i32
    %c0_i32_1 = arith.constant 0 : i32
    return %c0_i32, %c0_i32_0 : i32, i32
  }
  func.func @transform_6(%arg0: i32) -> (i32, i32) {
    %c0_i32 = arith.constant 0 : i32
    %c0_i32_0 = arith.constant 0 : i32
    %c0_i32_1 = arith.constant 0 : i32
    return %c0_i32, %c0_i32_0 : i32, i32
  }
  func.func @transform_7(%arg0: i32) -> (i32, i32) {
    %c0_i32 = arith.constant 0 : i32
    %c0_i32_0 = arith.constant 0 : i32
    return %arg0, %c0_i32 : i32, i32
  }
}

</mosaic_0001>

<bundles_post_ra>
// kernel: tpu_custom_call.1
= control target key start
LH: loop header
LB: loop body
LE: loop exit
PB: predicated region body
PF: predicated region fallthrough
CT: control target
= control target key end

     0   :  { %vm39_vm0 = vcmask 1043456   ;;  %vm35_vm1 = vcmask 31744   ;;  %v345_v0 = vmov 0.0   ;;  %vm346_vm2 = vmmov 0   ;;  %s431_s1 = inlined_call_operand.vmem [shape: f32[4,32], index: 1, kind: input, shape index: {}]   ;;  %s432_s0 = inlined_call_operand.vmem [shape: f32[8,4], index: 0, kind: input, shape index: {}]   ;;  %s433_s3 = inlined_call_operand.vmem [shape: f32[32,32], index: 3, kind: input, shape index: {}]   ;;  %s434_s5 = inlined_call_operand.vmem [shape: f32[32,2], index: 5, kind: input, shape index: {}]   ;;  %s435_s2 = inlined_call_operand.vmem [shape: f32[1,32], index: 2, kind: input, shape index: {}]   ;;  %s436_s4 = inlined_call_operand.vmem [shape: f32[1,32], index: 4, kind: input, shape index: {}]   ;;  %s437_s6 = inlined_call_operand.vmem [shape: f32[1,2], index: 6, kind: input, shape index: {}]   ;;  %s438_s7 = inlined_call_operand.vmem [shape: f32[8,2], index: 7, kind: output, shape index: {}]  }
   0x1   :  { %314 = vmatprep.subr.mxu0 %v345_v0  ;;  %v27_v1 = vld [vmem:[%s431_s1] sm:$0xf]  ;;  %316 = vmatprep.mubr.msk.f32.mxu0 %vm346_vm2, %v345_v0  ;;  %v119_v3 = vld [vmem:[%s433_s3 + $0x18] sm:$0xff]  ;;  %v118_v4 = vld [vmem:[%s433_s3 + $0x10] sm:$0xff]  ;;  %vm127_vm4 = vcmask 261120   ;;  %vm289_vm6 = vcmask 15360  }
   0x2   :  { %v26_v2 = vld [vmem:[%s432_s0] sm:$0xff]  ;;  %315 = vmatpush3.msk.msra.mxu0 %vm39_vm0, %v27_v1  ;;  %319 = vmatprep.subr.mxu1 %v345_v0  ;;  %v117_v5 = vld [vmem:[%s433_s3 + $0x8] sm:$0xff]  ;;  %v207_v7 = vld [vmem:[%s434_s5 + $0x18] sm:$0xff] }
   0x3   :  { %317 = vmatmul.mubr.msk.f32.vlgmr.msra.gmra.mxu0 %vm35_vm1, %v26_v2  ;;  %320 = vmatpush3.msra.mxu1 %v119_v3  ;;  %v116_v6 = vld [vmem:[%s433_s3] sm:$0xff]  ;;  %v206_v14 = vld [vmem:[%s434_s5 + $0x10] sm:$0xff]  ;;  %v205_v15 = vld [vmem:[%s434_s5 + $0x8] sm:$0xff] }
   0x4   :  { %321 = vmatprep.subr.mxu1 %v345_v0  ;;  %327 = vmatprep.mubr.msk.f32.mxu1 %vm346_vm2, %v345_v0  ;;  %v295_v8 = vld [vmem:[%s435_s2] ss:$0 sm:$0xff] }
   0x5   :  { %330 = vmatprep.subr.mxu0 %v345_v0  ;;  %338 = vmatprep.mubr.msk.f32.mxu0 %vm346_vm2, %v345_v0  ;;  %v204_v16 = vld [vmem:[%s434_s5] sm:$0xff] }
   0x6   :  { %322 = vmatpush3.msra.mxu1 %v118_v4  ;;  %331 = vmatpush3.msra.mxu0 %v207_v7  ;;  %v298_v17 = vld [vmem:[%s436_s4] ss:$0 sm:$0xff] }
   0x7   :  { %323 = vmatprep.subr.mxu1 %v345_v0  ;;  %332 = vmatprep.subr.mxu0 %v345_v0  ;;  %v300_v23 = vld [vmem:[%s437_s6] ss:$0 sm:$0xff] }
   0x8   :  { %324 = vmatpush3.msra.mxu1 %v117_v5  ;;  %333 = vmatpush3.msra.mxu0 %v206_v14 }
   0x9   :  { %325 = vmatprep.subr.mxu1 %v345_v0  ;;  %334 = vmatprep.subr.mxu0 %v345_v0 }
   0xa   :  { %326 = vmatpush3.msra.mxu1 %v116_v6  ;;  %335 = vmatpush3.msra.mxu0 %v205_v15 }
   0xb   :  { %336 = vmatprep.subr.mxu0 %v345_v0 }
   0xc   :  { %337 = vmatpush3.msra.mxu0 %v204_v16 }
  0xc3   :  { %v109_v9 = vpop.f32.mrf.mxu0 }
  0xc4   :  { %v110_v10 = vadd.f32 %v295_v8, %v109_v9 }
  0xc5   :  { %v318_v11 = vpop.f32.mrf.mxu0 }
  0xc6   :  { %vm113_vm3 = vcmp.ge.f32.partialorder %v110_v10, 0.0  ;;  %v114_v12 = vmul.f32 0.01, %v110_v10 }
  0xc8   :  { %v115_v13 = vsel %vm113_vm3, %v110_v10, %v114_v12 }
  0xc9   :  { %328 = vmatmul.mubr.msk.f32.vlgmr.msra.gmra.mxu1 %vm127_vm4, %v115_v13 }
 0x189   :  { %v197_v18 = vpop.f32.mrf.mxu1 }
 0x18a   :  { %v198_v19 = vadd.f32 %v298_v17, %v197_v18 }
 0x18b   :  { %v329_v20 = vpop.f32.mrf.mxu1 }
 0x18c   :  { %vm201_vm5 = vcmp.ge.f32.partialorder %v198_v19, 0.0  ;;  %v202_v21 = vmul.f32 0.01, %v198_v19 }
 0x18e   :  { %v203_v22 = vsel %vm201_vm5, %v198_v19, %v202_v21 }
 0x18f   :  { %339 = vmatmul.mubr.msk.f32.vlgmr.msra.gmra.mxu0 %vm127_vm4, %v203_v22 }
 0x24f   :  { %v284_v24 = vpop.f32.mrf.mxu0 }
 0x250   :  { %v285_v25 = vadd.f32 %v300_v23, %v284_v24 }
 0x251   :  { %v340_v26 = vpop.f32.mrf.mxu0 }
 0x252   :  { %343 = vtanh.f32 %v285_v25 }
 0x25f   :  { %v344_v27 = vpop.eup %343 }
 0x260   :  { %290 = vst.msk [vmem:[%s438_s7] sm:$0xff] %vm289_vm6, %v344_v27 }

</bundles_post_ra>
